<compile_context>
chip_gen: v6e
topology: v6e:2x2x1
jax: 0.10.0
libtpu: 0.0.40
codegen_flags: <defaults>
</compile_context>

<pallas_src>
import functools

import jax
import jax.numpy as jnp
from jax import lax
from jax.experimental import pallas as pl
from jax.experimental.pallas import tpu as pltpu

LN_EPS = 1e-5
_INV_SQRT2 = 0.7071067811865476


def _round_up(x, m):
    return (x + m - 1) // m * m


def _physical_vmem_bytes():
    try:
        return int(pltpu.get_tpu_info().vmem_capacity_bytes)
    except Exception:
        return 64 * 2 ** 20  # conservative (v7x per-TC) fallback


def _ffn_kernel(x_ref, g_ref, beta_ref, w1_ref, b1_ref, w2_ref, b2_ref,
                o_ref, xn_ref, acc_ref, *, d_real):
    """Grid = (row tiles, H chunks).  Axis 1 (H) is the reduction axis."""
    j = pl.program_id(1)

    # ---- first H chunk: LayerNorm the row tile once, zero the accumulator ----
    @pl.when(j == 0)
    def _():
        x = x_ref[...].astype(jnp.float32)                       # (tm, Dp)
        inv_d = jnp.float32(1.0 / d_real)
        # Single-pass stats: padded lanes are zero, so both sums are exact for
        # the real D lanes and no lane mask is needed.
        s1 = jnp.sum(x, axis=-1, keepdims=True)
        s2 = jnp.sum(x * x, axis=-1, keepdims=True)
        mean = s1 * inv_d
        var = s2 * inv_d - mean * mean
        xn = (x - mean) * lax.rsqrt(var + LN_EPS)
        xn = xn * g_ref[...].astype(jnp.float32) + beta_ref[...].astype(jnp.float32)
        xn_ref[...] = xn.astype(xn_ref.dtype)                    # compute dtype scratch
        acc_ref[...] = jnp.zeros_like(acc_ref)

    # ---- per-H-chunk: Linear(D -> th), GELU, partial Linear(th -> D) ----
    h = jnp.dot(xn_ref[...], w1_ref[...],
                preferred_element_type=jnp.float32)               # (tm, th)
    h = h + b1_ref[...].astype(jnp.float32)
    # Exact erf GELU (nn.GELU default).  Contingency (only if VALU-bound):
    # swap to the tanh approximation so it rides the EUP slot.
    h = 0.5 * h * (1.0 + lax.erf(h * _INV_SQRT2))
    # Dropout(p=0.0) is identity.
    acc_ref[...] += jnp.dot(h.astype(w2_ref.dtype), w2_ref[...],
                            preferred_element_type=jnp.float32)    # (tm, Dp)

    # ---- last H chunk: add output bias and store (lane-dense) ----
    @pl.when(j == pl.num_programs(1) - 1)
    def _():
        o_ref[...] = (acc_ref[...]
                      + b2_ref[...].astype(jnp.float32)).astype(o_ref.dtype)


def prepare_ffn_params(gamma, beta, w1, b1, w2, b2, *,
                       compute_dtype=jnp.bfloat16, th=1024):
    """One-time padding / casting of the FFN parameters (hoisted out of the
    per-step call so weight copies are not re-materialized every forward)."""
    D, H = w1.shape
    Dp = _round_up(D, 128)
    Hp = _round_up(H, 128)
    wsz = jnp.dtype(compute_dtype).itemsize

    # Hidden chunk: multiple of 128 lanes, clamped so the double-buffered
    # W1+W2 chunks stay within ~40% of the chip's physical VMEM.
    phys = _physical_vmem_bytes()
    th = max(128, min(_round_up(th, 128), Hp))
    while th > 128 and 4 * th * Dp * wsz > 0.4 * phys:
        th = max(128, th // 2)
    Hp = _round_up(Hp, th)   # padded W1 cols / W2 rows are zero -> contribute 0

    def pad2(a, shape, dtype):
        a = a.astype(dtype)
        if a.shape == tuple(shape):
            return a
        out = jnp.zeros(shape, dtype)
        return out.at[: a.shape[0], : a.shape[1]].set(a)

    return dict(
        g=pad2(gamma.reshape(1, D), (1, Dp), gamma.dtype),
        beta=pad2(beta.reshape(1, D), (1, Dp), beta.dtype),
        w1=pad2(w1, (Dp, Hp), compute_dtype),
        b1=pad2(b1.reshape(1, H), (1, Hp), b1.dtype),
        w2=pad2(w2, (Hp, Dp), compute_dtype),
        b2=pad2(b2.reshape(1, D), (1, Dp), b2.dtype),
        D=D, H=H, Dp=Dp, Hp=Hp, th=th, compute_dtype=compute_dtype,
    )


def feedforward_pallas(x, params, *, tm=1024):
    """x: (B, S, D). params from prepare_ffn_params (w1 = linear1.weight.T, etc.)."""
    B, S, D = x.shape
    assert D == params["D"]
    M = B * S
    Dp, Hp, th = params["Dp"], params["Hp"], params["th"]
    cdt = params["compute_dtype"]
    wsz = jnp.dtype(cdt).itemsize
    xsz = x.dtype.itemsize

    # Row tile: large, 8-sublane granule, clamped to the problem.
    tm = max(8, min(_round_up(tm, 8), _round_up(M, 8)))
    # v7x has 2 TensorCores: make sure the "parallel" row axis has >= 2 steps.
    if _round_up(M, tm) // tm < 2 and tm > 8:
        tm = max(8, _round_up(pl.cdiv(_round_up(M, 8), 2), 8))

    # VMEM footprint estimate (double-buffered operands + scratch); shrink tm
    # if it would not fit ~80% of the physical budget (matters on v7x / 64 MiB).
    phys = _physical_vmem_bytes()
    budget = int(0.80 * phys)

    def est(tm_):
        return (2 * (tm_ * Dp * xsz                 # x tile
                     + 2 * Dp * 4                   # gamma, beta
                     + Dp * th * wsz                # W1 chunk
                     + th * 4                       # b1 chunk
                     + th * Dp * wsz                # W2 chunk
                     + Dp * 4                       # b2
                     + tm_ * Dp * xsz)              # out tile
                + tm_ * Dp * wsz                    # xn scratch (compute dtype)
                + tm_ * Dp * 4)                     # f32 accumulator

    while est(tm) > budget and tm > 8:
        tm = max(8, _round_up(tm // 2, 8))

    Mp = _round_up(M, tm)
    grid = (Mp // tm, Hp // th)
    vmem_limit = int(min(int(0.85 * phys), max(2 * est(tm), 32 * 2 ** 20)))

    # Pad x only if needed.  NOTE: padded rows beyond M run the full FFN on
    # garbage (xn == beta) but are sliced off below -- bounded, intentional.
    x2 = x.reshape(M, D)
    if (Mp, Dp) != (M, D):
        x2 = jnp.zeros((Mp, Dp), x.dtype).at[:M, :D].set(x2)

    kernel = functools.partial(_ffn_kernel, d_real=D)
    out = pl.pallas_call(
        kernel,
        out_shape=jax.ShapeDtypeStruct((Mp, Dp), x.dtype),
        grid_spec=pltpu.PrefetchScalarGridSpec(
            num_scalar_prefetch=0,
            grid=grid,
            in_specs=[
                pl.BlockSpec((tm, Dp), lambda i, j: (i, 0)),   # x rows
                pl.BlockSpec((1, Dp), lambda i, j: (0, 0)),    # ln gamma
                pl.BlockSpec((1, Dp), lambda i, j: (0, 0)),    # ln beta
                pl.BlockSpec((Dp, th), lambda i, j: (0, j)),   # W1 H-chunk
                pl.BlockSpec((1, th), lambda i, j: (0, j)),    # b1 H-chunk
                pl.BlockSpec((th, Dp), lambda i, j: (j, 0)),   # W2 H-chunk
                pl.BlockSpec((1, Dp), lambda i, j: (0, 0)),    # b2
            ],
            out_specs=pl.BlockSpec((tm, Dp), lambda i, j: (i, 0)),
            scratch_shapes=[
                pltpu.VMEM((tm, Dp), cdt),          # LayerNorm output (compute dtype)
                pltpu.VMEM((tm, Dp), jnp.float32),  # y accumulator
            ],
        ),
        compiler_params=pltpu.CompilerParams(
            dimension_semantics=("parallel", "arbitrary"),
            vmem_limit_bytes=vmem_limit,
        ),
    )(x2, params["g"], params["beta"], params["w1"], params["b1"],
      params["w2"], params["b2"])

    if (Mp, Dp) != (M, D):
        out = out[:M, :D]
    return out.reshape(B, S, D)


def feedforward_ref(x, gamma, beta, w1, b1, w2, b2):
    mean = jnp.mean(x, axis=-1, keepdims=True)
    var = jnp.mean((x - mean) ** 2, axis=-1, keepdims=True)
    xn = (x - mean) / jnp.sqrt(var + LN_EPS) * gamma + beta
    h = xn @ w1 + b1
    h = 0.5 * h * (1.0 + lax.erf(h * _INV_SQRT2))
    return h @ w2 + b2


if __name__ == "__main__":
    B, S, D, H = 2, 8, 32, 64  # batch, seq, dim, hidden_dim

    key = jax.random.PRNGKey(0)
    kx, kw1, kb1, kw2, kb2 = jax.random.split(key, 5)

    x = jax.random.normal(kx, (B, S, D), dtype=jnp.float32)

    # Deterministic parameter init (synthetic; not a checkpoint load).
    gamma = jnp.ones((D,), jnp.float32)
    beta = jnp.zeros((D,), jnp.float32)
    w1 = jax.random.normal(kw1, (D, H), jnp.float32) * (1.0 / jnp.sqrt(D))
    b1 = jax.random.normal(kb1, (H,), jnp.float32) * 0.01
    w2 = jax.random.normal(kw2, (H, D), jnp.float32) * (1.0 / jnp.sqrt(H))
    b2 = jax.random.normal(kb2, (D,), jnp.float32) * 0.01

    ref = feedforward_ref(x, gamma, beta, w1, b1, w2, b2)

    # 1) f32 compute path: should match the f32 reference tightly.
    p_f32 = prepare_ffn_params(gamma, beta, w1, b1, w2, b2,
                               compute_dtype=jnp.float32)
    out_f32 = jax.block_until_ready(feedforward_pallas(x, p_f32))
    assert out_f32.shape == (B, S, D)
    assert jnp.allclose(out_f32, ref, atol=2e-4, rtol=2e-4)

    # 2) bf16-weight path (recommended perf config): MXU-native dtype;
    #    tolerance loosened accordingly (f32 accumulation throughout).
    p_bf16 = prepare_ffn_params(gamma, beta, w1, b1, w2, b2,
                                compute_dtype=jnp.bfloat16)
    out_bf16 = jax.block_until_ready(feedforward_pallas(x, p_bf16))
    assert out_bf16.shape == (B, S, D)
    assert jnp.allclose(out_bf16, ref, atol=8e-2, rtol=8e-2)

    print("KERNEL_OK")
</pallas_src>

<mosaic_0001>
module attributes {stable_mosaic.version = 11 : i64} {
  func.func @_ffn_kernel(%arg0: i32, %arg1: i32, %arg2: memref<8x128xf32, #tpu.memory_space<vmem>>, %arg3: memref<1x128xf32, #tpu.memory_space<vmem>>, %arg4: memref<1x128xf32, #tpu.memory_space<vmem>>, %arg5: memref<128x128xf32, #tpu.memory_space<vmem>>, %arg6: memref<1x128xf32, #tpu.memory_space<vmem>>, %arg7: memref<128x128xf32, #tpu.memory_space<vmem>>, %arg8: memref<1x128xf32, #tpu.memory_space<vmem>>, %arg9: memref<8x128xf32, #tpu.memory_space<vmem>>, %arg10: memref<8x128xf32, #tpu.memory_space<vmem>>, %arg11: memref<8x128xf32, #tpu.memory_space<vmem>>) attributes {dimension_semantics = [#tpu.dimension_semantics<parallel>, #tpu.dimension_semantics<arbitrary>], iteration_bounds = array<i64: 2, 1>, scalar_prefetch = 0 : i64, scratch_operands = 2 : i64, tpu.core_type = #tpu.core_type<tc>, window_params = [{transform_indices = @transform_0, window_bounds = array<i64: 8, 128>}, {pipeline_mode = #tpu.pipeline_mode<synchronous>, transform_indices = @transform_1, window_bounds = array<i64: 1, 128>}, {pipeline_mode = #tpu.pipeline_mode<synchronous>, transform_indices = @transform_2, window_bounds = array<i64: 1, 128>}, {transform_indices = @transform_3, window_bounds = array<i64: 128, 128>}, {transform_indices = @transform_4, window_bounds = array<i64: 1, 128>}, {transform_indices = @transform_5, window_bounds = array<i64: 128, 128>}, {pipeline_mode = #tpu.pipeline_mode<synchronous>, transform_indices = @transform_6, window_bounds = array<i64: 1, 128>}, {transform_indices = @transform_7, window_bounds = array<i64: 8, 128>}]} {
    %c0_i32 = arith.constant 0 : i32
    %0 = arith.cmpi eq, %arg1, %c0_i32 : i32
    %1 = arith.extui %0 : i1 to i32
    %c0_i32_0 = arith.constant 0 : i32
    %2 = arith.cmpi ne, %1, %c0_i32_0 : i32
    scf.if %2 {
      %c0_18 = arith.constant 0 : index
      %c0_19 = arith.constant 0 : index
      %25 = vector.load %arg2[%c0_18, %c0_19] : memref<8x128xf32, #tpu.memory_space<vmem>>, vector<8x128xf32>
      %cst_20 = arith.constant dense<0.000000e+00> : vector<8xf32>
      %26 = vector.multi_reduction <add>, %25, %cst_20 [1] : vector<8x128xf32> to vector<8xf32>
      %27 = vector.shape_cast %26 : vector<8xf32> to vector<8x1xf32>
      %28 = arith.mulf %25, %25 : vector<8x128xf32>
      %cst_21 = arith.constant dense<0.000000e+00> : vector<8xf32>
      %29 = vector.multi_reduction <add>, %28, %cst_21 [1] : vector<8x128xf32> to vector<8xf32>
      %30 = vector.shape_cast %29 : vector<8xf32> to vector<8x1xf32>
      %cst_22 = arith.constant 3.125000e-02 : f32
      %31 = vector.broadcast %cst_22 : f32 to vector<8x1xf32>
      %32 = arith.mulf %27, %31 : vector<8x1xf32>
      %cst_23 = arith.constant 3.125000e-02 : f32
      %33 = vector.broadcast %cst_23 : f32 to vector<8x1xf32>
      %34 = arith.mulf %30, %33 : vector<8x1xf32>
      %35 = arith.mulf %32, %32 : vector<8x1xf32>
      %36 = arith.subf %34, %35 : vector<8x1xf32>
      %37 = vector.broadcast %32 : vector<8x1xf32> to vector<8x128xf32>
      %38 = arith.subf %25, %37 : vector<8x128xf32>
      %cst_24 = arith.constant 9.99999974E-6 : f32
      %39 = vector.broadcast %cst_24 : f32 to vector<8x1xf32>
      %40 = arith.addf %36, %39 : vector<8x1xf32>
      %41 = math.rsqrt %40 : vector<8x1xf32>
      %42 = vector.broadcast %41 : vector<8x1xf32> to vector<8x128xf32>
      %43 = arith.mulf %38, %42 : vector<8x128xf32>
      %c0_25 = arith.constant 0 : index
      %c0_26 = arith.constant 0 : index
      %44 = vector.load %arg3[%c0_25, %c0_26] : memref<1x128xf32, #tpu.memory_space<vmem>>, vector<1x128xf32>
      %45 = vector.broadcast %44 : vector<1x128xf32> to vector<8x128xf32>
      %46 = arith.mulf %43, %45 : vector<8x128xf32>
      %c0_27 = arith.constant 0 : index
      %c0_28 = arith.constant 0 : index
      %47 = vector.load %arg4[%c0_27, %c0_28] : memref<1x128xf32, #tpu.memory_space<vmem>>, vector<1x128xf32>
      %48 = vector.broadcast %47 : vector<1x128xf32> to vector<8x128xf32>
      %49 = arith.addf %46, %48 : vector<8x128xf32>
      %c0_29 = arith.constant 0 : index
      %c0_30 = arith.constant 0 : index
      %50 = vector.load %arg10[%c0_29, %c0_30] : memref<8x128xf32, #tpu.memory_space<vmem>>, vector<8x128xf32>
      tpu.vector_store %arg10[%c0_29, %c0_30], %49 {strides = array<i32>} : memref<8x128xf32, #tpu.memory_space<vmem>>, vector<8x128xf32>,
      %cst_31 = arith.constant 0.000000e+00 : f32
      %51 = vector.broadcast %cst_31 : f32 to vector<8x128xf32>
      %c0_32 = arith.constant 0 : index
      %c0_33 = arith.constant 0 : index
      %52 = vector.load %arg11[%c0_32, %c0_33] : memref<8x128xf32, #tpu.memory_space<vmem>>, vector<8x128xf32>
      tpu.vector_store %arg11[%c0_32, %c0_33], %51 {strides = array<i32>} : memref<8x128xf32, #tpu.memory_space<vmem>>, vector<8x128xf32>,
    } else {
    }
    %c0 = arith.constant 0 : index
    %c0_1 = arith.constant 0 : index
    %3 = vector.load %arg10[%c0, %c0_1] : memref<8x128xf32, #tpu.memory_space<vmem>>, vector<8x128xf32>
    %c0_2 = arith.constant 0 : index
    %c0_3 = arith.constant 0 : index
    %4 = vector.load %arg5[%c0_2, %c0_3] : memref<128x128xf32, #tpu.memory_space<vmem>>, vector<128x128xf32>
    %cst = arith.constant dense<0.000000e+00> : vector<8x128xf32>
    %5 = tpu.matmul %3, %4, %cst {dimension_numbers = #tpu.dot_dimension_numbers<[1], [0], [0], [1], [0, 0, 1, 1], [], []>} : vector<8x128xf32>, vector<128x128xf32>, vector<8x128xf32> -> vector<8x128xf32>
    %c0_4 = arith.constant 0 : index
    %c0_5 = arith.constant 0 : index
    %6 = vector.load %arg6[%c0_4, %c0_5] : memref<1x128xf32, #tpu.memory_space<vmem>>, vector<1x128xf32>
    %7 = vector.broadcast %6 : vector<1x128xf32> to vector<8x128xf32>
    %8 = arith.addf %5, %7 : vector<8x128xf32>
    %cst_6 = arith.constant 5.000000e-01 : f32
    %9 = vector.broadcast %cst_6 : f32 to vector<8x128xf32>
    %10 = arith.mulf %9, %8 : vector<8x128xf32>
    %cst_7 = arith.constant 0.707106769 : f32
    %11 = vector.broadcast %cst_7 : f32 to vector<8x128xf32>
    %12 = arith.mulf %8, %11 : vector<8x128xf32>
    %13 = math.erf %12 : vector<8x128xf32>
    %cst_8 = arith.constant 1.000000e+00 : f32
    %14 = vector.broadcast %cst_8 : f32 to vector<8x128xf32>
    %15 = arith.addf %14, %13 : vector<8x128xf32>
    %16 = arith.mulf %10, %15 : vector<8x128xf32>
    %c0_9 = arith.constant 0 : index
    %c0_10 = arith.constant 0 : index
    %17 = vector.load %arg11[%c0_9, %c0_10] : memref<8x128xf32, #tpu.memory_space<vmem>>, vector<8x128xf32>
    %c0_11 = arith.constant 0 : index
    %c0_12 = arith.constant 0 : index
    %18 = vector.load %arg7[%c0_11, %c0_12] : memref<128x128xf32, #tpu.memory_space<vmem>>, vector<128x128xf32>
    %cst_13 = arith.constant dense<0.000000e+00> : vector<8x128xf32>
    %19 = tpu.matmul %16, %18, %cst_13 {dimension_numbers = #tpu.dot_dimension_numbers<[1], [0], [0], [1], [0, 0, 1, 1], [], []>} : vector<8x128xf32>, vector<128x128xf32>, vector<8x128xf32> -> vector<8x128xf32>
    %20 = arith.addf %17, %19 : vector<8x128xf32>
    %c0_14 = arith.constant 0 : index
    %c0_15 = arith.constant 0 : index
    %21 = vector.load %arg11[%c0_14, %c0_15] : memref<8x128xf32, #tpu.memory_space<vmem>>, vector<8x128xf32>
    tpu.vector_store %arg11[%c0_14, %c0_15], %20 {strides = array<i32>} : memref<8x128xf32, #tpu.memory_space<vmem>>, vector<8x128xf32>,
    %c0_i32_16 = arith.constant 0 : i32
    %22 = arith.cmpi eq, %arg1, %c0_i32_16 : i32
    %23 = arith.extui %22 : i1 to i32
    %c0_i32_17 = arith.constant 0 : i32
    %24 = arith.cmpi ne, %23, %c0_i32_17 : i32
    scf.if %24 {
      %c0_18 = arith.constant 0 : index
      %c0_19 = arith.constant 0 : index
      %25 = vector.load %arg11[%c0_18, %c0_19] : memref<8x128xf32, #tpu.memory_space<vmem>>, vector<8x128xf32>
      %c0_20 = arith.constant 0 : index
      %c0_21 = arith.constant 0 : index
      %26 = vector.load %arg8[%c0_20, %c0_21] : memref<1x128xf32, #tpu.memory_space<vmem>>, vector<1x128xf32>
      %27 = vector.broadcast %26 : vector<1x128xf32> to vector<8x128xf32>
      %28 = arith.addf %25, %27 : vector<8x128xf32>
      %c0_22 = arith.constant 0 : index
      %c0_23 = arith.constant 0 : index
      %29 = vector.load %arg9[%c0_22, %c0_23] : memref<8x128xf32, #tpu.memory_space<vmem>>, vector<8x128xf32>
      tpu.vector_store %arg9[%c0_22, %c0_23], %28 {strides = array<i32>} : memref<8x128xf32, #tpu.memory_space<vmem>>, vector<8x128xf32>,
    } else {
    }
    return
  }
  func.func @transform_0(%arg0: i32, %arg1: i32) -> (i32, i32) {
    %c0_i32 = arith.constant 0 : i32
    %c0_i32_0 = arith.constant 0 : i32
    return %arg0, %c0_i32 : i32, i32
  }
  func.func @transform_1(%arg0: i32, %arg1: i32) -> (i32, i32) {
    %c0_i32 = arith.constant 0 : i32
    %c0_i32_0 = arith.constant 0 : i32
    %c0_i32_1 = arith.constant 0 : i32
    return %c0_i32, %c0_i32_0 : i32, i32
  }
  func.func @transform_2(%arg0: i32, %arg1: i32) -> (i32, i32) {
    %c0_i32 = arith.constant 0 : i32
    %c0_i32_0 = arith.constant 0 : i32
    %c0_i32_1 = arith.constant 0 : i32
    return %c0_i32, %c0_i32_0 : i32, i32
  }
  func.func @transform_3(%arg0: i32, %arg1: i32) -> (i32, i32) {
    %c0_i32 = arith.constant 0 : i32
    %c0_i32_0 = arith.constant 0 : i32
    return %c0_i32, %arg1 : i32, i32
  }
  func.func @transform_4(%arg0: i32, %arg1: i32) -> (i32, i32) {
    %c0_i32 = arith.constant 0 : i32
    %c0_i32_0 = arith.constant 0 : i32
    return %c0_i32, %arg1 : i32, i32
  }
  func.func @transform_5(%arg0: i32, %arg1: i32) -> (i32, i32) {
    %c0_i32 = arith.constant 0 : i32
    %c0_i32_0 = arith.constant 0 : i32
    return %arg1, %c0_i32 : i32, i32
  }
  func.func @transform_6(%arg0: i32, %arg1: i32) -> (i32, i32) {
    %c0_i32 = arith.constant 0 : i32
    %c0_i32_0 = arith.constant 0 : i32
    %c0_i32_1 = arith.constant 0 : i32
    return %c0_i32, %c0_i32_0 : i32, i32
  }
  func.func @transform_7(%arg0: i32, %arg1: i32) -> (i32, i32) {
    %c0_i32 = arith.constant 0 : i32
    %c0_i32_0 = arith.constant 0 : i32
    return %arg0, %c0_i32 : i32, i32
  }
}

</mosaic_0001>

<bundles_post_ra>
// kernel: tpu_custom_call.1
= control target key start
LH: loop header
LB: loop body
LE: loop exit
PB: predicated region body
PF: predicated region fallthrough
CT: control target
= control target key end

     0   :  { %s1396_s0 = inlined_call_operand.hbm [shape: f32[16,128], index: 0, kind: input, shape index: {}]   ;;  %s1397_s1 = inlined_call_operand.vmem [shape: f32[1,128], index: 1, kind: input, shape index: {}]   ;;  %s1398_s2 = inlined_call_operand.vmem [shape: f32[1,128], index: 2, kind: input, shape index: {}]   ;;  %s1399_s3 = inlined_call_operand.hbm [shape: f32[128,128], index: 3, kind: input, shape index: {}]   ;;  %s1400_s4 = inlined_call_operand.vmem [shape: f32[1,128], index: 4, kind: input, shape index: {}]   ;;  %s1401_s5 = inlined_call_operand.hbm [shape: f32[128,128], index: 5, kind: input, shape index: {}]   ;;  %s1402_s6 = inlined_call_operand.vmem [shape: f32[1,128], index: 6, kind: input, shape index: {}]   ;;  %s1403_s7 = inlined_call_operand.hbm [shape: f32[16,128], index: 7, kind: output, shape index: {}]  }
   0x1   :  { %1408 = sst [smem:[#allocation15_spill]] %s1399_s3 }
   0x2   :  { %1409 = sst [smem:[#allocation16_spill]] %s1401_s5 }
   0x3   :  { %12 = vsyncpa [#allocation5], 0 }
   0x4   :  { %14 = vsyncpa [#allocation5 + $0x1], 0 }
   0x5   :  { %15 = vsyncpa [#allocation8], 0 }
   0x6   :  { %16 = vsyncpa [#allocation6], 0 }
   0x7   :  { %18 = vsyncpa [#allocation6 + $0x1], 0  ;;  %s1160_s24 = smov 0   ;;  %s1162_s25 = smov 0  }
   0x8   :  { %s1164_s26 = smov 0   ;;  %s1166_s27 = smov 0  }
   0x9   :  { %s1168_s28 = smov 0   ;;  %s1170_s29 = smov 0  }
   0xa LB: > { %s729_s30 = sadd.s32 4294967295, %s1110_s29   ;;  %s730_s8 = sadd.s32 4294967294, %s1110_s29   ;;  %s1110_s29 = sphi %s1170_s29, %s24_s29   ;;  %s1106_s28 = sphi %s1168_s28, %s1430_s28   ;;  %s1102_s27 = sphi %s1166_s27, %s1429_s27   ;;  %s1098_s26 = sphi %s1164_s26, %s1428_s26   ;;  %s1094_s25 = sphi %s1162_s25, %s1427_s25   ;;  %s1090_s24 = sphi %s1160_s24, %s1426_s24  }
   0xb   : > { %p56_p0 = scmp.ne.s32.totalorder %s1094_s25, %s1090_s24  ;;  %p1194_p1 = scmp.eq.s32.totalorder %s729_s30, 0 }
   0xc   : > { %p1198_p2 = scmp.eq.s32.totalorder %s729_s30, 1  ;;  %p227_p3 = scmp.eq.s32.totalorder %s730_s8, 1 }
   0xd   : > { %s1410_s9 = scalar_select %p1194_p1, 1, 0 }
   0xe   : > { %p1204_p4 = por %p1194_p1, %p56_p0  ;;  %p731_p5 = scmp.ge.s32.totalorder %s1110_s29, 1 }
   0xf   : > { %p1209_p6 = por %p227_p3, %p56_p0  ;;  %p234_p7 = scmp.lt.s32.totalorder %s1110_s29, 3 }
  0x10   : > { %s1412_s11 = scalar_select %p1204_p4, 1, 0 }
  0x11   : > { %s1413_s12 = scalar_select %p1209_p6, 1, 0 }
  0x12   : > { %p1214_p8 = pnand %p731_p5, %p234_p7  ;;  %s1112_s14 = smov [#allocation7]  }
  0x13   : > { %s254_s15 = sshll.u32 %s1112_s14, 4  ;;  %s1113_s17 = smov [#allocation9]   ;;  %s255_s15 = int_to_ptr.vmem [resolvable:$true] %s254_s15 }
  0x14   : > { %p867_p9 = pneg %p1214_p8  ;;  %s276_s18 = sshll.u32 %s1113_s17, 4  ;;  %s277_s18 = int_to_ptr.vmem [resolvable:$true] %s276_s18 }
  0x15   : > { %s957_s19 = scalar_lea.vmem %s255_s15, 2048  ;;  %p965_p5 = scmp.lt.s32.totalorder %s255_s15, %s255_s15 }
  0x16   : > { %p1223_p11 = pnand %p867_p9, %p1194_p1  ;;  %p958_p13 = scmp.ne.s32.totalorder %s255_s15, %s957_s19 }
  0x17   : > { %p966_p7 = scmp.lt.s32.totalorder %s957_s19, %s957_s19 }
  0x18   : > { %p948_p12 = pneg %p1223_p11 }
  0x19   : > { %p967_p10 = por %p966_p7, %p965_p5 }
  0x1a   : > { %p960_p0 = pnand %p958_p13, %p948_p12 }
  0x1c   : > { %p961_p3 = pneg %p960_p0 }
  0x1e   : > { %p968_p9 = pnand %p967_p10, %p961_p3 }
  0x20   : > { %971 = shalt.err (!%p968_p9)
}
  0x21   : > { %s1114_s20 = smov 128   ;;  %s1115_s21 = smov 8  }
  0x22   : > { %s1416_s3 = sld [smem:[#allocation15_spill]]  ;;  %s983_s30 = scalar_lea.vmem %s277_s18, 2048 }
  0x23   : > { %p984_p6 = scmp.ne.s32.totalorder %s277_s18, %s983_s30  ;;  %p991_p1 = scmp.lt.s32.totalorder %s277_s18, %s277_s18 }
  0x24   : > { %p992_p4 = scmp.lt.s32.totalorder %s983_s30, %s983_s30 }
  0x25   : > { %p986_p13 = pnand %p984_p6, %p948_p12 }
  0x26   : > { %p993_p5 = por %p992_p4, %p991_p1 }
  0x27   : > { %p987_p0 = pneg %p986_p13 }
  0x28   : > { %870 = dma.hbm_to_vmem [thread:$0]  (!%p1223_p11), %s1416_s3, 2048, %s255_s15, [#allocation8], %s1114_s20, %s1114_s20, %s1115_s21  }
  0x29   : > { %p994_p10 = pnand %p993_p5, %p987_p0 }
  0x2b   : > { %997 = shalt.err (!%p994_p10)
}
  0x2c   : > { %s1417_s5 = sld [smem:[#allocation16_spill]]  ;;  %s36_s15 = sadd.s32 1, %s1106_s28 }
  0x2d   : > { %s43_s17 = sadd.s32 1, %s1098_s26  ;;  %p38_p1 = scmp.ge.s32.totalorder %s36_s15, 2 }
  0x2e   : > { %p50_p4 = scmp.ne.s32.totalorder %s1098_s26, %s1094_s25  ;;  %p51_p6 = scmp.eq.s32.totalorder %s1110_s29, 0 }
  0x2f   : > { %p884_p12 = scmp.lt.s32.totalorder %s1110_s29, 2  ;;  %s1432_s15 = smov (%p38_p1, %s36_s15), 0 }
  0x30   : > { %1418 = sst [smem:[#allocation14_spill]] %s1432_s15  ;;  %p52_p3 = por %p51_p6, %p50_p4 }
  0x31   : > { %p1255_p7 = por %p1198_p2, %p50_p4  ;;  %s40_s19 = ssub.s32 %s1106_s28, %s1432_s15 }
  0x32   : > { %873 = dma.hbm_to_vmem [thread:$0]  (!%p1223_p11), %s1417_s5, 2048, %s277_s18, [#allocation8], %s1114_s20, %s1114_s20, %s1115_s21  }
  0x33   : > { %s293_s22 = sand.u32 1, %s1098_s26   ;;  %p41_p9 = scmp.eq.s32.totalorder %s40_s19, 0 }
  0x34   : > { %s736_s18 = sshll.u32 %s293_s22, 3  ;;  %s737_s20 = sshll.u32 %s1106_s28, 7 }
  0x35   : > { %s1264_s21 = scalar_select %p41_p9, %s1098_s26, %s43_s17  }
  0x36   : > { %s302_s8 = scalar_lea.hbm %s1396_s0, %s737_s20  ;;  %s297_s14 = scalar_lea.vmem [#allocation4], %s736_s18 }
  0x37   : > { %s304_s3 = sshll.u32 %s297_s14, 4  ;;  %p1271_p11 = pnand %p884_p12, %p52_p3  ;;  %s305_s3 = int_to_ptr.vmem [resolvable:$true] %s304_s3 }
  0x38   : > { %s294_s5 = scalar_lea.sflag [#allocation5], %s293_s22  ;;  %s1011_s19 = scalar_lea.vmem %s305_s3, 128 }
  0x39   : > { %p1000_p2 = pneg %p1271_p11  ;;  %p1012_p13 = scmp.ne.s32.totalorder %s305_s3, %s1011_s19 }
  0x3a   : > { %s1116_s17 = smov [#allocation4]  }
  0x3b   : > { %p1014_p0 = pnand %p1012_p13, %p1000_p2  ;;  %s1016_s15 = sshll.u32 %s1116_s17, 4  ;;  %s1017_s15 = int_to_ptr.vmem [resolvable:$false] %s1016_s15 }
  0x3c   : > { %s1018_s20 = scalar_lea.vmem %s1017_s15, 256  ;;  %p1019_p10 = scmp.lt.s32.totalorder %s305_s3, %s1017_s15 }
  0x3d   : > { %p1015_p5 = pneg %p1014_p0  ;;  %p1020_p1 = scmp.lt.s32.totalorder %s1018_s20, %s1011_s19 }
  0x3f   : > { %p1021_p4 = por %p1020_p1, %p1019_p10 }
  0x41   : > { %p1022_p6 = pnand %p1021_p4, %p1015_p5 }
  0x43   : > { %1025 = shalt.err (!%p1022_p6)
}
  0x44   : > { %877 = dma.hbm_to_vmem [thread:$0]  (!%p1271_p11), %s302_s8, 128, %s305_s3, %s294_s5  }
  0x45   : > { %313 = sbr.rel (%p1214_p8) target bundleno = 671 (0x29f), region = 48  ;;  %s1282_s22 = sand.u32 (!%p1214_p8), 1, %s1094_s25  }
  0x46   : > { %s739_s18 = sshll.u32 (!%p1214_p8), %s1282_s22, 3  ;;  %s316_s23 = scalar_lea.sflag (!%p1214_p8), [#allocation5], %s1282_s22 }
  0x47   : > { %s319_s15 = scalar_lea.vmem (!%p1214_p8), [#allocation4], %s739_s18  ;;  %p1421_p12 = scmp.ne.s32.totalorder (!%p1214_p8), %s1412_s11, 0 }
  0x4a   : > { %1077 = dma.done.wait (%p1421_p12), %s316_s23, 128  }
  0x4b   : > { %1079 = vsyncadd (%p1421_p12), %s316_s23, 4294967168  ;;  %p1422_p3 = scmp.ne.s32.totalorder %s1410_s9, 0 }
  0x4d   : > { %1081 = dma.done.wait (%p1422_p3), [#allocation8], 4096  }
  0x4e   : > { %1083 = vsyncadd (%p1422_p3), [#allocation8], 4294963200  ;;  %v1117_v0 = vmov 0.0   ;;  %v1298_v1 = vld [vmem:[%s319_s15] sm:$0xff]  ;;  %v415_v5 = vld [vmem:[#allocation7 + $0x68] sm:$0xff]  ;;  %vm1118_vm0 = vmmov 0  }
  0x4f   : > { %785 = vmatprep.subr.mxu0 %v1117_v0  ;;  %820 = vmatprep.subr.mxu1 %v1117_v0  ;;  %v417_v2 = vld [vmem:[#allocation7 + $0x78] sm:$0xff]  ;;  %v372_v3 = vmul.f32 %v1298_v1, %v1298_v1  ;;  %v416_v4 = vld [vmem:[#allocation7 + $0x70] sm:$0xff]  ;;  %v414_v6 = vld [vmem:[#allocation7 + $0x60] sm:$0xff]  ;;  %s748_s10 = sshll.u32 %s1102_s27, 7  ;;  %s360_s19 = scalar_lea.vmem [#allocation10], %s739_s18 }
  0x50   : > { %370 = vadd.xlane.f32.xlu0 %v1298_v1  ;;  %786 = vmatpush3.msra.mxu0 %v417_v2  ;;  %v413_v7 = vld [vmem:[#allocation7 + $0x58] sm:$0xff]  ;;  %v412_v8 = vld [vmem:[#allocation7 + $0x50] sm:$0xff]  ;;  %v411_v9 = vld [vmem:[#allocation7 + $0x48] sm:$0xff]  ;;  %s616_s17 = sshll.u32 %s360_s19, 4  ;;  %s1354_s15 = scalar_lea.hbm %s1403_s7, %s748_s10  ;;  %s617_s17 = int_to_ptr.vmem [resolvable:$true] %s616_s17 }
  0x51   : > { %787 = vmatprep.subr.mxu0 %v1117_v0  ;;  %v410_v10 = vld [vmem:[#allocation7 + $0x40] sm:$0xff]  ;;  %817 = vmatprep.mubr.msk.f32.mxu0 %vm1118_vm0, %v1117_v0  ;;  %v409_v11 = vld [vmem:[#allocation7 + $0x38] sm:$0xff]  ;;  %v408_v12 = vld [vmem:[#allocation7 + $0x30] sm:$0xff]  ;;  %s603_s3 = scalar_lea.sflag [#allocation6], %s1282_s22  ;;  %s1026_s5 = scalar_lea.vmem %s617_s17, 128 }
  0x52   : > { %788 = vmatpush3.msra.mxu0 %v416_v4  ;;  %852 = vmatprep.mubr.msk.f32.mxu1 %vm1118_vm0, %v1117_v0  ;;  %v407_v13 = vld [vmem:[#allocation7 + $0x28] sm:$0xff]  ;;  %v406_v14 = vld [vmem:[#allocation7 + $0x20] sm:$0xff]  ;;  %v405_v15 = vld [vmem:[#allocation7 + $0x18] sm:$0xff]  ;;  %p1027_p8 = scmp.ne.s32.totalorder %s617_s17, %s1026_s5  ;;  %s1119_s27 = smov [#allocation10]  }
  0x53   : > { %789 = vmatprep.subr.mxu0 %v1117_v0  ;;  %v404_v16 = vld [vmem:[#allocation7 + $0x10] sm:$0xff]  ;;  %v403_v17 = vld [vmem:[#allocation7 + $0x8] sm:$0xff]  ;;  %v402_v18 = vld [vmem:[#allocation7] sm:$0xff]  ;;  %s1030_s9 = sshll.u32 %s1119_s27, 4  ;;  %s1031_s9 = int_to_ptr.vmem [resolvable:$false] %s1030_s9 }
  0x54   : > { %373 = vadd.xlane.f32.xlu0 %v372_v3  ;;  %790 = vmatpush3.msra.mxu0 %v415_v5  ;;  %v516_v19 = vld [vmem:[#allocation9 + $0x78] sm:$0xff]  ;;  %v515_v20 = vld [vmem:[#allocation9 + $0x70] sm:$0xff]  ;;  %v514_v21 = vld [vmem:[#allocation9 + $0x68] sm:$0xff]  ;;  %p1028_p9 = pnand %p1027_p8, %p1255_p7  ;;  %s1032_s18 = scalar_lea.vmem %s1031_s9, 256 }
  0x55   : > { %791 = vmatprep.subr.mxu0 %v1117_v0  ;;  %821 = vmatpush3.msra.mxu1 %v516_v19  ;;  %v513_v22 = vld [vmem:[#allocation9 + $0x60] sm:$0xff]  ;;  %v743_v32 = vld [vmem:[%s1397_s1] ss:$0 sm:$0xff]  ;;  %v512_v37 = vld [vmem:[#allocation9 + $0x58] sm:$0xff]  ;;  %p1033_p2 = scmp.lt.s32.totalorder %s617_s17, %s1031_s9  ;;  %p1034_p13 = scmp.lt.s32.totalorder %s1032_s18, %s1026_s5 }
  0x56   : > { %792 = vmatpush3.msra.mxu0 %v414_v6  ;;  %822 = vmatprep.subr.mxu1 %v1117_v0  ;;  %v744_v34 = vld [vmem:[%s1398_s2] ss:$0 sm:$0xff]  ;;  %v510_v39 = vld [vmem:[#allocation9 + $0x48] sm:$0xff]  ;;  %v509_v40 = vld [vmem:[#allocation9 + $0x40] sm:$0xff]  ;;  %p1029_p11 = pneg %p1028_p9 }
  0x57   : > { %793 = vmatprep.subr.mxu0 %v1117_v0  ;;  %823 = vmatpush3.msra.mxu1 %v515_v20  ;;  %v511_v38 = vld [vmem:[#allocation9 + $0x50] sm:$0xff]  ;;  %v508_v41 = vld [vmem:[#allocation9 + $0x38] sm:$0xff]  ;;  %v506_v43 = vld [vmem:[#allocation9 + $0x28] sm:$0xff]  ;;  %p1035_p0 = por %p1034_p13, %p1033_p2 }
  0x58   : > { %794 = vmatpush3.msra.mxu0 %v413_v7  ;;  %824 = vmatprep.subr.mxu1 %v1117_v0  ;;  %v507_v42 = vld [vmem:[#allocation9 + $0x30] sm:$0xff]  ;;  %v505_v44 = vld [vmem:[#allocation9 + $0x20] sm:$0xff]  ;;  %v504_v45 = vld [vmem:[#allocation9 + $0x18] sm:$0xff] }
  0x59   : > { %795 = vmatprep.subr.mxu0 %v1117_v0  ;;  %825 = vmatpush3.msra.mxu1 %v514_v21  ;;  %v503_v46 = vld [vmem:[#allocation9 + $0x10] sm:$0xff]  ;;  %v502_v47 = vld [vmem:[#allocation9 + $0x8] sm:$0xff]  ;;  %v501_v48 = vld [vmem:[#allocation9] sm:$0xff]  ;;  %p1036_p5 = pnand %p1035_p0, %p1029_p11 }
  0x5a   : > { %796 = vmatpush3.msra.mxu0 %v412_v8  ;;  %826 = vmatprep.subr.mxu1 %v1117_v0  ;;  %v745_v49 = vld [vmem:[%s1400_s4] ss:$0 sm:$0xff] }
  0x5b   : > { %797 = vmatprep.subr.mxu0 %v1117_v0  ;;  %827 = vmatpush3.msra.mxu1 %v513_v22  ;;  %v746_v58 = vld [vmem:[%s1402_s6] ss:$0 sm:$0xff] }
  0x5c   : > { %798 = vmatpush3.msra.mxu0 %v411_v9  ;;  %828 = vmatprep.subr.mxu1 %v1117_v0 }
  0x5d   : > { %799 = vmatprep.subr.mxu0 %v1117_v0  ;;  %829 = vmatpush3.msra.mxu1 %v512_v37 }
  0x5e   : > { %800 = vmatpush3.msra.mxu0 %v410_v10  ;;  %830 = vmatprep.subr.mxu1 %v1117_v0 }
  0x5f   : > { %801 = vmatprep.subr.mxu0 %v1117_v0  ;;  %831 = vmatpush3.msra.mxu1 %v511_v38 }
  0x60   : > { %802 = vmatpush3.msra.mxu0 %v409_v11  ;;  %832 = vmatprep.subr.mxu1 %v1117_v0 }
  0x61   : > { %803 = vmatprep.subr.mxu0 %v1117_v0  ;;  %833 = vmatpush3.msra.mxu1 %v510_v39 }
  0x62   : > { %804 = vmatpush3.msra.mxu0 %v408_v12  ;;  %834 = vmatprep.subr.mxu1 %v1117_v0 }
  0x63   : > { %805 = vmatprep.subr.mxu0 %v1117_v0  ;;  %835 = vmatpush3.msra.mxu1 %v509_v40 }
  0x64   : > { %806 = vmatpush3.msra.mxu0 %v407_v13  ;;  %836 = vmatprep.subr.mxu1 %v1117_v0 }
  0x65   : > { %807 = vmatprep.subr.mxu0 %v1117_v0  ;;  %837 = vmatpush3.msra.mxu1 %v508_v41 }
  0x66   : > { %808 = vmatpush3.msra.mxu0 %v406_v14  ;;  %838 = vmatprep.subr.mxu1 %v1117_v0 }
  0x67   : > { %809 = vmatprep.subr.mxu0 %v1117_v0  ;;  %839 = vmatpush3.msra.mxu1 %v507_v42 }
  0x68   : > { %810 = vmatpush3.msra.mxu0 %v405_v15  ;;  %840 = vmatprep.subr.mxu1 %v1117_v0 }
  0x69   : > { %811 = vmatprep.subr.mxu0 %v1117_v0  ;;  %841 = vmatpush3.msra.mxu1 %v506_v43 }
  0x6a   : > { %812 = vmatpush3.msra.mxu0 %v404_v16  ;;  %842 = vmatprep.subr.mxu1 %v1117_v0 }
  0x6b   : > { %813 = vmatprep.subr.mxu0 %v1117_v0  ;;  %843 = vmatpush3.msra.mxu1 %v505_v44 }
  0x6c   : > { %814 = vmatpush3.msra.mxu0 %v403_v17  ;;  %844 = vmatprep.subr.mxu1 %v1117_v0 }
  0x6d   : > { %815 = vmatprep.subr.mxu0 %v1117_v0  ;;  %845 = vmatpush3.msra.mxu1 %v504_v45 }
  0x6e   : > { %816 = vmatpush3.msra.mxu0 %v402_v18  ;;  %846 = vmatprep.subr.mxu1 %v1117_v0 }
  0x6f   : > { %847 = vmatpush3.msra.mxu1 %v503_v46 }
  0x70   : > { %848 = vmatprep.subr.mxu1 %v1117_v0 }
  0x71   : > { %849 = vmatpush3.msra.mxu1 %v502_v47 }
  0x72   : > { %850 = vmatprep.subr.mxu1 %v1117_v0 }
  0x73   : > { %851 = vmatpush3.msra.mxu1 %v501_v48 }
  0xd9   : > { %v371_v23 = vpop.xlane.xlu0 %370 }
  0xda   : > { %v375_v24 = vmul.f32 0.03125, %v371_v23 }
  0xdc   : > { %v377_v26 = vmul.f32 %v375_v24, %v375_v24  ;;  %v379_v30 = vsub.f32 %v1298_v1, %v375_v24 }
  0xdd   : > { %v374_v25 = vpop.xlane.xlu0 %373 }
  0xde   : > { %v376_v27 = vmul.f32 0.03125, %v374_v25 }
  0xe0   : > { %v378_v28 = vsub.f32 %v376_v27, %v377_v26 }
  0xe2   : > { %v380_v29 = vadd.f32 1e-05, %v378_v28 }
  0xe4   : > { %942 = vrsqrt.f32 %v380_v29 }
  0xf1   : > { %v943_v31 = vpop.eup %942 }
  0xf2   : > { %v382_v33 = vmul.f32 %v943_v31, %v379_v30 }
  0xf4   : > { %v390_v35 = vmul.f32 %v743_v32, %v382_v33 }
  0xf6   : > { %v398_v36 = vadd.f32 %v744_v34, %v390_v35 }
  0xf8   : > { %818 = vmatmul.mubr.f32.vlgmr.msra.gmra.mxu0 %v398_v36 }
 0x1b8   : > { %v491_v50 = vpop.f32.mrf.mxu0 }
 0x1b9   : > { %v492_v51 = vadd.f32 %v745_v49, %v491_v50 }
 0x1ba   : > { %v819_v52 = vpop.f32.mrf.mxu0 }
 0x1bb   : > { %v496_v53 = vmul.f32 0.70710677, %v492_v51  ;;  %v495_v55 = vmul.f32 0.5, %v492_v51 }
 0x1bd   : > { %944 = verf.f32 %v496_v53 }
 0x1ca   : > { %v945_v54 = vpop.eup %944 }
 0x1cb   : > { %v498_v56 = vadd.f32 1.0, %v945_v54 }
 0x1cd   : > { %v499_v57 = vmul.f32 %v498_v56, %v495_v55 }
 0x1cf   : > { %853 = vmatmul.mubr.f32.vlgmr.msra.gmra.mxu1 %v499_v57 }
 0x28f   : > { %v583_v59 = vpop.f32.mrf.mxu1 }
 0x290   : > { %v600_v60 = vadd.f32 %v746_v58, %v583_v59 }
 0x291   : > { %v854_v61 = vpop.f32.mrf.mxu1 }
 0x292   : > { %601 = vst [vmem:[%s360_s19] sm:$0xff] %v600_v60 }
 0x293   : > { %1039 = shalt.err (!%p1036_p5)
}
 0x294   : > { %s1040_s11 = scalar_lea.hbm %s1354_s15, 128  ;;  %s1044_s30 = scalar_lea.hbm %s1403_s7, 256 }
 0x295   : > { %p1041_p10 = scmp.ne.s32.totalorder %s1354_s15, %s1040_s11  ;;  %p1045_p6 = scmp.lt.s32.totalorder %s1354_s15, %s1403_s7 }
 0x296   : > { %p1046_p12 = scmp.lt.s32.totalorder %s1044_s30, %s1040_s11 }
 0x297   : > { %p1042_p1 = pnand %p1041_p10, %p1255_p7 }
 0x298   : > { %p1047_p3 = por %p1046_p12, %p1045_p6 }
 0x299   : > { %p1043_p4 = pneg %p1042_p1 }
 0x29b   : > { %p1048_p8 = pnand %p1047_p3, %p1043_p4 }
 0x29d   : > { %1051 = shalt.err (!%p1048_p8)
}
 0x29e   : > { %865 = dma.vmem_to_hbm [thread:$0]  (%p1255_p7), %s617_s17, 128, %s1354_s15, %s603_s3  }
 0x29f PF: > { %s628_s10 = sand.u32 1, %s1090_s24   ;;  %p1423_p9 = scmp.ne.s32.totalorder %s1413_s12, 0 }
 0x2a0   : > { %p1424_p11 = scmp.ge.s32.totalorder %s1110_s29, 2  ;;  %s629_s19 = scalar_lea.sflag [#allocation6], %s628_s10 }
 0x2a2   : > { %p879_p2 = pnand %p1424_p11, %p1423_p9 }
 0x2a4   : > { %p880_p13 = pneg %p879_p2 }
 0x2a6   : > { %1085 = dma.done.wait (%p880_p13), %s629_s19, 128  }
 0x2a7   : > { %1087 = vsyncadd (%p880_p13), %s629_s19, 4294967168  ;;  %s24_s29 = sadd.s32 1, %s1110_s29   ;;  %s1425_s16 = sld [smem:[#allocation14_spill]] }
 0x2a8   : > { %p21_p0 = scmp.ge.s32.totalorder %s24_s29, 4   ;;  %s1426_s24 = smov %s1094_s25 }
 0x2a9   : > { %s1427_s25 = smov %s1098_s26  ;;  %s1428_s26 = smov %s1264_s21 }
 0x2aa   : > { %s1429_s27 = smov %s1106_s28  ;;  %23 = sbr.rel (!%p21_p0) target bundleno = 10 (0xa), region = 114 }
 0x2ad   : > { %s1430_s28 = smov %s1425_s16 }
 0x2af   :  { %634 = vsyncpa [#allocation5], 1 }
 0x2b0   :  { %636 = vsyncpa [#allocation5 + $0x1], 1 }
 0x2b1   :  { %637 = vsyncpa [#allocation8], 1 }
 0x2b2   :  { %638 = vsyncpa [#allocation6], 1 }
 0x2b3   :  { %640 = vsyncpa [#allocation6 + $0x1], 1 }

</bundles_post_ra>
